<compile_context>
chip_gen: v6e
topology: v6e:2x2x1
jax: 0.10.0
libtpu: 0.0.40
codegen_flags: <defaults>
</compile_context>

<pallas_src>
import functools

import jax
import jax.numpy as jnp
from jax.experimental import pallas as pl
from jax.experimental.pallas import tpu as pltpu

EPS = 1e-9


def _squash2d(x):
    # squash(x) = ||x||^2/(1+||x||^2) / sqrt(eps+||x||^2) * x   (norm over last axis)
    # Matches the reference epsilon placement exactly; rsqrt rides the EUP slot.
    n2 = jnp.sum(x * x, axis=-1, keepdims=True)
    scale = n2 / (1.0 + n2) * jax.lax.rsqrt(EPS + n2)
    return scale * x


def induction_kernel(sup_ref, qry_ref, we_ref, be_ref, wsup_ref, bsup_ref,
                     wsum_ref, bfc_ref, out_ref, *, E, C, K, Q, hidden,
                     iterations):
    del Q  # shapes are carried by the refs
    EC = E * C
    KEC = K * EC

    sup = sup_ref[0]       # (K*E*C, D_in)  k-major row order (bf16)
    qry = qry_ref[0]       # (E*C*Q, D_in)  episode-major      (bf16)
    we = we_ref[...]       # (D_in, H) bf16   encoder weight (query path)
    be = be_ref[...]       # (1, H)    f32    encoder bias   (query path)
    wsup = wsup_ref[...]   # (D_in, H) bf16   pre-fused W_enc @ W_dr (support path)
    bsup = bsup_ref[...]   # (1, H)    f32    pre-fused b_enc @ W_dr + b_dr
    w_sum = wsum_ref[0]    # scalar f32 = sum(w_fc)   (fc Linear(h,1) collapse)
    b_fc = bfc_ref[0]      # scalar f32

    # ---- support path: encoder + DynamicRouting.W fused into ONE MXU matmul ----
    e = jnp.dot(sup, wsup, preferred_element_type=jnp.float32) + bsup    # (KEC, H)
    e_hat = _squash2d(e)

    # ---- query path: encoder only ----
    qfeat = jnp.dot(qry, we, preferred_element_type=jnp.float32) + be    # (ECQ, H)

    # ---- dynamic routing, vectorized over K (k-major sublane blocks) ----
    inv_k = 1.0 / K
    b = jnp.zeros((KEC, 1), jnp.float32)
    c_i = jnp.zeros((EC, hidden), jnp.float32)
    for it in range(iterations):                                   # static (3)
        if it == 0:
            # b == 0  =>  softmax coefficients are exactly 1/K: no exp/recip needed.
            c_hat = e_hat[0:EC, :]
            for k in range(1, K):
                c_hat = c_hat + e_hat[k * EC:(k + 1) * EC, :]
            c_hat = c_hat * inv_k
        else:
            # Squashed vectors have norm < 1, so |b| <= iterations; exp is safe
            # without max-subtraction (mathematically identical to softmax).
            eb = jnp.exp(b)                                        # (KEC, 1)  EUP
            den = eb[0:EC, :]
            for k in range(1, K):
                den = den + eb[k * EC:(k + 1) * EC, :]
            di = eb * pl.reciprocal(jnp.tile(den, (K, 1)), approx=True)   # (KEC, 1)
            w_e = e_hat * di                      # one lane-broadcast multiply
            c_hat = w_e[0:EC, :]
            for k in range(1, K):
                c_hat = c_hat + w_e[k * EC:(k + 1) * EC, :]
        c_i = _squash2d(c_hat)                                     # (EC, H)
        if it + 1 < iterations:        # the reference's final b update is never used
            c_tiled = jnp.tile(c_i, (K, 1))                        # (KEC, H)
            b = b + jnp.sum(e_hat * c_tiled, axis=-1, keepdims=True)

    # ---- RelationModule + fc: one lane-packed bf16 matmul ----
    # The reference RelationModule overwrites q@M with q@s.T every slice, so M is
    # dead code and all h relation slices are identical; Linear(h,1)+Sigmoid
    # collapses to sigmoid(qs*sum(w_fc)+b_fc).  We score every query row against
    # the prototypes of every episode in the block (extra FLOPs on an idle MXU,
    # lane-dense output) and the wrapper keeps only the own-episode block diagonal.
    qs = jax.lax.dot_general(
        qfeat.astype(jnp.bfloat16), c_i.astype(jnp.bfloat16),
        (((1,), (1,)), ((), ())),
        preferred_element_type=jnp.float32)                        # (ECQ, EC)
    logits = qs * w_sum + b_fc
    out_ref[0] = (1.0 / (1.0 + jnp.exp(-logits))).astype(out_ref.dtype)  # exact sigmoid


def _tpu_generation():
    try:
        return jax.devices()[0].device_kind.lower()
    except Exception:  # CPU / interpret fallback
        return ""


def _pick_episodes_per_block(B, C, K, Q, *, target_rows=256, lane_target=128,
                             prefer_even_grid=False):
    """Pick E (episodes per grid block), a divisor of B.

    Priorities (from the performance review):
      1. (v7x) even grid so both TensorCores get equal work
      2. lane-dense output: E*C a multiple of 128 (unmasked stores, full MXU columns)
      3. routing slices sublane-aligned: E*C a multiple of 8
      4. otherwise get the lane dim as close to 128 as B allows
      5. per-step row budget E*C*max(K,Q) <= target_rows; larger E breaks ties
         (fewer ~0.35us grid steps on single-TC chips).
    """
    divisors = [e for e in range(1, B + 1) if B % e == 0]

    def score(e):
        lanes = e * C
        rows = e * C * max(K, Q)
        grid = B // e
        return (
            (not prefer_even_grid) or (grid % 2 == 0),
            lanes % 128 == 0,
            lanes % 8 == 0,
            min(lanes, lane_target),
            rows <= target_rows,
            e,
        )

    return max(divisors, key=score)


def induction_network_forward(support, query, params, *, C, K, Q,
                              matmul_dtype=jnp.bfloat16,
                              episodes_per_block=None):
    """support: (B*C*K, D_in), query: (B*C*Q, D_in)  ->  (relation_score, pred)."""
    in_dim = support.shape[-1]
    hidden = params["w_enc"].shape[1]
    B = support.shape[0] // (C * K)
    assert support.shape[0] == B * C * K
    assert query.shape[0] == B * C * Q

    kind = _tpu_generation()
    prefer_even_grid = "v7" in kind          # v7x: 2 TensorCores/chip (megacore balance)
    target_rows = 128 if "v5" in kind else 256

    E = episodes_per_block or _pick_episodes_per_block(
        B, C, K, Q, target_rows=target_rows, prefer_even_grid=prefer_even_grid)
    assert B % E == 0
    nb = B // E
    EC = E * C
    CQ = C * Q

    # Support rows arrive ordered (episode, class, k); regroup each block of E
    # episodes into k-major order so routing only takes contiguous sublane slices
    # (pure layout plumbing, stays in XLA).
    sup = support.reshape(nb, E, C, K, in_dim)
    sup = jnp.transpose(sup, (0, 3, 1, 2, 4)).reshape(nb, K * EC, in_dim)
    qry = query.reshape(nb, E * CQ, in_dim)

    # bf16 matmul inputs (f32 accumulation in-kernel); biases / routing stay f32.
    sup = sup.astype(matmul_dtype)
    qry = qry.astype(matmul_dtype)

    w_enc_f32 = params["w_enc"].astype(jnp.float32)
    b_enc_f32 = params["b_enc"].astype(jnp.float32)
    w_dr_f32 = params["w_dr"].astype(jnp.float32)
    b_dr_f32 = params["b_dr"].astype(jnp.float32)

    w_enc = w_enc_f32.astype(matmul_dtype)
    # Pre-fuse encoder + DynamicRouting.W on the support path.
    w_sup = (w_enc_f32 @ w_dr_f32).astype(matmul_dtype)
    b_sup = (b_enc_f32 @ w_dr_f32 + b_dr_f32).astype(jnp.float32)
    b_enc = b_enc_f32

    # fc Linear(h,1) over h identical relation slices collapses to a scalar multiply.
    w_sum = jnp.sum(params["w_fc"]).reshape(1).astype(jnp.float32)
    b_fc = params["b_fc"].reshape(1).astype(jnp.float32)

    kernel = functools.partial(induction_kernel, E=E, C=C, K=K, Q=Q,
                               hidden=hidden, iterations=3)

    # NOTE: weights are grid-invariant; if in_dim/hidden grow beyond toy sizes, add
    # pipeline_mode=pl.Buffered(1) on the weight specs and set vmem_limit_bytes
    # (matters on v7x's 64 MiB VMEM).  Irrelevant at 32x32 operands.
    out = pl.pallas_call(
        kernel,
        out_shape=jax.ShapeDtypeStruct((nb, E * CQ, EC), jnp.float32),
        grid_spec=pltpu.PrefetchScalarGridSpec(
            num_scalar_prefetch=0,
            grid=(nb,),
            in_specs=[
                pl.BlockSpec((1, K * EC, in_dim), lambda i: (i, 0, 0)),   # support
                pl.BlockSpec((1, E * CQ, in_dim), lambda i: (i, 0, 0)),   # query
                pl.BlockSpec((in_dim, hidden), lambda i: (0, 0)),         # W_enc
                pl.BlockSpec((1, hidden), lambda i: (0, 0)),              # b_enc
                pl.BlockSpec((in_dim, hidden), lambda i: (0, 0)),         # W_sup = W_enc@W_dr
                pl.BlockSpec((1, hidden), lambda i: (0, 0)),              # b_sup
                pl.BlockSpec(memory_space=pltpu.MemorySpace.SMEM),        # sum(W_fc)
                pl.BlockSpec(memory_space=pltpu.MemorySpace.SMEM),        # b_fc
            ],
            out_specs=pl.BlockSpec((1, E * CQ, EC), lambda i: (i, 0, 0)),
        ),
        compiler_params=pltpu.CompilerParams(
            dimension_semantics=("parallel",)),
    )(sup, qry, w_enc, b_enc, w_sup, b_sup, w_sum, b_fc)

    # out[n, ep*CQ + r, :] = scores of query row r (episode ep) against the class
    # prototypes of every episode in the block; keep only the own-episode block
    # diagonal (pure layout plumbing in XLA).
    out = out.reshape(nb, E, CQ, E, C)
    out = jnp.diagonal(out, axis1=1, axis2=3)          # (nb, CQ, C, E)
    out = jnp.transpose(out, (0, 3, 1, 2))             # (nb, E, CQ, C)
    relation_score = out.reshape(B * CQ, C)
    pred = jnp.argmax(relation_score, axis=1)          # glue: trivial post-processing
    return relation_score, pred


def make_params(key, in_dim, hidden, h):
    k0, k1, k2, k3, k4, k5 = jax.random.split(key, 6)
    return {
        # simple linear "encoder" with hidden_size = hidden
        # TODO(synk): the reference takes an arbitrary `encoder` module; modeled here as a Linear.
        "w_enc": 0.1 * jax.random.normal(k0, (in_dim, hidden), jnp.float32),
        "b_enc": 0.1 * jax.random.normal(k1, (1, hidden), jnp.float32),
        # DynamicRouting.W : Linear(hidden, hidden, bias=True)
        "w_dr": 0.1 * jax.random.normal(k2, (hidden, hidden), jnp.float32),
        "b_dr": 0.1 * jax.random.normal(k3, (1, hidden), jnp.float32),
        # fc: Linear(h, 1) (+ Sigmoid applied in-kernel)
        "w_fc": 0.1 * jax.random.normal(k4, (1, h), jnp.float32),
        "b_fc": 0.1 * jax.random.normal(k5, (1, 1), jnp.float32),
        # RelationModule.M (feature_dim, feature_dim, h) is dead code in the
        # reference forward (its matmul result is overwritten), so it is omitted.
    }


if __name__ == "__main__":
    # 4-way, 2-shot, 2 queries/class, 8 episodes.
    B, C, K, Q = 8, 4, 2, 2
    in_dim, hidden, h = 32, 32, 16

    key = jax.random.PRNGKey(0)
    k_params, k_sup, k_qry = jax.random.split(key, 3)
    params = make_params(k_params, in_dim, hidden, h)

    support = jax.random.normal(k_sup, (B * C * K, in_dim), jnp.float32)
    query = jax.random.normal(k_qry, (B * C * Q, in_dim), jnp.float32)

    relation_score, pred = induction_network_forward(
        support, query, params, C=C, K=K, Q=Q)
    jax.block_until_ready((relation_score, pred))

    assert relation_score.shape == (B * C * Q, C)
    assert pred.shape == (B * C * Q,)
    assert bool(jnp.all(jnp.isfinite(relation_score)))
    assert bool(jnp.all((relation_score >= 0.0) & (relation_score <= 1.0)))
    print("KERNEL_OK")
</pallas_src>

<mosaic_0001>
module attributes {stable_mosaic.version = 11 : i64} {
  func.func @induction_kernel(%arg0: i32, %arg1: memref<1x64x32xbf16, #tpu.memory_space<vmem>>, %arg2: memref<1x64x32xbf16, #tpu.memory_space<vmem>>, %arg3: memref<32x32xbf16, #tpu.memory_space<vmem>>, %arg4: memref<1x32xf32, #tpu.memory_space<vmem>>, %arg5: memref<32x32xbf16, #tpu.memory_space<vmem>>, %arg6: memref<1x32xf32, #tpu.memory_space<vmem>>, %arg7: memref<1xf32, #tpu.memory_space<smem>>, %arg8: memref<1xf32, #tpu.memory_space<smem>>, %arg9: memref<1x64x32xf32, #tpu.memory_space<vmem>>) attributes {dimension_semantics = [#tpu.dimension_semantics<parallel>], iteration_bounds = array<i64: 1>, scalar_prefetch = 0 : i64, scratch_operands = 0 : i64, tpu.core_type = #tpu.core_type<tc>, window_params = [{transform_indices = @transform_0, window_bounds = array<i64: 1, 64, 32>}, {transform_indices = @transform_1, window_bounds = array<i64: 1, 64, 32>}, {pipeline_mode = #tpu.pipeline_mode<synchronous>, transform_indices = @transform_2, window_bounds = array<i64: 32, 32>}, {pipeline_mode = #tpu.pipeline_mode<synchronous>, transform_indices = @transform_3, window_bounds = array<i64: 1, 32>}, {pipeline_mode = #tpu.pipeline_mode<synchronous>, transform_indices = @transform_4, window_bounds = array<i64: 32, 32>}, {pipeline_mode = #tpu.pipeline_mode<synchronous>, transform_indices = @transform_5, window_bounds = array<i64: 1, 32>}, {transform_indices = @transform_6, window_bounds = array<i64: 1>}, {transform_indices = @transform_7, window_bounds = array<i64: 1>}, {transform_indices = @transform_8, window_bounds = array<i64: 1, 64, 32>}]} {
    %c0 = arith.constant 0 : index
    %c0_0 = arith.constant 0 : index
    %c0_1 = arith.constant 0 : index
    %0 = vector.load %arg1[%c0, %c0_0, %c0_1] : memref<1x64x32xbf16, #tpu.memory_space<vmem>>, vector<1x64x32xbf16>
    %1 = vector.shape_cast %0 : vector<1x64x32xbf16> to vector<64x32xbf16>
    %c0_2 = arith.constant 0 : index
    %c0_3 = arith.constant 0 : index
    %c0_4 = arith.constant 0 : index
    %2 = vector.load %arg2[%c0_2, %c0_3, %c0_4] : memref<1x64x32xbf16, #tpu.memory_space<vmem>>, vector<1x64x32xbf16>
    %3 = vector.shape_cast %2 : vector<1x64x32xbf16> to vector<64x32xbf16>
    %c0_5 = arith.constant 0 : index
    %c0_6 = arith.constant 0 : index
    %4 = vector.load %arg3[%c0_5, %c0_6] : memref<32x32xbf16, #tpu.memory_space<vmem>>, vector<32x32xbf16>
    %c0_7 = arith.constant 0 : index
    %c0_8 = arith.constant 0 : index
    %5 = vector.load %arg4[%c0_7, %c0_8] : memref<1x32xf32, #tpu.memory_space<vmem>>, vector<1x32xf32>
    %c0_9 = arith.constant 0 : index
    %c0_10 = arith.constant 0 : index
    %6 = vector.load %arg5[%c0_9, %c0_10] : memref<32x32xbf16, #tpu.memory_space<vmem>>, vector<32x32xbf16>
    %c0_11 = arith.constant 0 : index
    %c0_12 = arith.constant 0 : index
    %7 = vector.load %arg6[%c0_11, %c0_12] : memref<1x32xf32, #tpu.memory_space<vmem>>, vector<1x32xf32>
    %c0_13 = arith.constant 0 : index
    %8 = memref.load %arg7[%c0_13] : memref<1xf32, #tpu.memory_space<smem>>
    %c0_14 = arith.constant 0 : index
    %9 = memref.load %arg8[%c0_14] : memref<1xf32, #tpu.memory_space<smem>>
    %cst = arith.constant dense<0.000000e+00> : vector<64x32xf32>
    %10 = tpu.matmul %1, %6, %cst {dimension_numbers = #tpu.dot_dimension_numbers<[1], [0], [0], [1], [0, 0, 1, 1], [], []>} : vector<64x32xbf16>, vector<32x32xbf16>, vector<64x32xf32> -> vector<64x32xf32>
    %11 = vector.broadcast %7 : vector<1x32xf32> to vector<64x32xf32>
    %12 = arith.addf %10, %11 : vector<64x32xf32>
    %13 = arith.mulf %12, %12 : vector<64x32xf32>
    %cst_15 = arith.constant dense<0.000000e+00> : vector<64xf32>
    %14 = vector.multi_reduction <add>, %13, %cst_15 [1] : vector<64x32xf32> to vector<64xf32>
    %15 = vector.shape_cast %14 : vector<64xf32> to vector<64x1xf32>
    %cst_16 = arith.constant 1.000000e+00 : f32
    %16 = vector.broadcast %cst_16 : f32 to vector<64x1xf32>
    %17 = arith.addf %16, %15 : vector<64x1xf32>
    %18 = arith.divf %15, %17 : vector<64x1xf32>
    %cst_17 = arith.constant 9.99999971E-10 : f32
    %19 = vector.broadcast %cst_17 : f32 to vector<64x1xf32>
    %20 = arith.addf %19, %15 : vector<64x1xf32>
    %21 = math.rsqrt %20 : vector<64x1xf32>
    %22 = arith.mulf %18, %21 : vector<64x1xf32>
    %23 = vector.broadcast %22 : vector<64x1xf32> to vector<64x32xf32>
    %24 = arith.mulf %23, %12 : vector<64x32xf32>
    %cst_18 = arith.constant dense<0.000000e+00> : vector<64x32xf32>
    %25 = tpu.matmul %3, %4, %cst_18 {dimension_numbers = #tpu.dot_dimension_numbers<[1], [0], [0], [1], [0, 0, 1, 1], [], []>} : vector<64x32xbf16>, vector<32x32xbf16>, vector<64x32xf32> -> vector<64x32xf32>
    %26 = vector.broadcast %5 : vector<1x32xf32> to vector<64x32xf32>
    %27 = arith.addf %25, %26 : vector<64x32xf32>
    %cst_19 = arith.constant 0.000000e+00 : f32
    %28 = vector.broadcast %cst_19 : f32 to vector<64x1xf32>
    %29 = vector.extract_strided_slice %24 {offsets = [0, 0], sizes = [32, 32], strides = [1, 1]} : vector<64x32xf32> to vector<32x32xf32>
    %30 = vector.extract_strided_slice %24 {offsets = [32, 0], sizes = [32, 32], strides = [1, 1]} : vector<64x32xf32> to vector<32x32xf32>
    %31 = arith.addf %29, %30 : vector<32x32xf32>
    %cst_20 = arith.constant 5.000000e-01 : f32
    %32 = vector.broadcast %cst_20 : f32 to vector<32x32xf32>
    %33 = arith.mulf %31, %32 : vector<32x32xf32>
    %34 = arith.mulf %33, %33 : vector<32x32xf32>
    %cst_21 = arith.constant dense<0.000000e+00> : vector<32xf32>
    %35 = vector.multi_reduction <add>, %34, %cst_21 [1] : vector<32x32xf32> to vector<32xf32>
    %36 = vector.shape_cast %35 : vector<32xf32> to vector<32x1xf32>
    %cst_22 = arith.constant 1.000000e+00 : f32
    %37 = vector.broadcast %cst_22 : f32 to vector<32x1xf32>
    %38 = arith.addf %37, %36 : vector<32x1xf32>
    %39 = arith.divf %36, %38 : vector<32x1xf32>
    %cst_23 = arith.constant 9.99999971E-10 : f32
    %40 = vector.broadcast %cst_23 : f32 to vector<32x1xf32>
    %41 = arith.addf %40, %36 : vector<32x1xf32>
    %42 = math.rsqrt %41 : vector<32x1xf32>
    %43 = arith.mulf %39, %42 : vector<32x1xf32>
    %44 = vector.broadcast %43 : vector<32x1xf32> to vector<32x32xf32>
    %45 = arith.mulf %44, %33 : vector<32x32xf32>
    %46 = tpu.concatenate %45, %45 in 0 : vector<32x32xf32>, vector<32x32xf32> -> vector<64x32xf32>
    %47 = arith.mulf %24, %46 : vector<64x32xf32>
    %cst_24 = arith.constant dense<0.000000e+00> : vector<64xf32>
    %48 = vector.multi_reduction <add>, %47, %cst_24 [1] : vector<64x32xf32> to vector<64xf32>
    %49 = vector.shape_cast %48 : vector<64xf32> to vector<64x1xf32>
    %50 = arith.addf %28, %49 : vector<64x1xf32>
    %51 = math.exp %50 : vector<64x1xf32>
    %52 = vector.extract_strided_slice %51 {offsets = [0, 0], sizes = [32, 1], strides = [1, 1]} : vector<64x1xf32> to vector<32x1xf32>
    %53 = vector.extract_strided_slice %51 {offsets = [32, 0], sizes = [32, 1], strides = [1, 1]} : vector<64x1xf32> to vector<32x1xf32>
    %54 = arith.addf %52, %53 : vector<32x1xf32>
    %55 = tpu.concatenate %54, %54 in 0 : vector<32x1xf32>, vector<32x1xf32> -> vector<64x1xf32>
    %56 = tpu.reciprocal %55 {approx = true} : vector<64x1xf32> -> vector<64x1xf32>
    %57 = arith.mulf %51, %56 : vector<64x1xf32>
    %58 = vector.broadcast %57 : vector<64x1xf32> to vector<64x32xf32>
    %59 = arith.mulf %24, %58 : vector<64x32xf32>
    %60 = vector.extract_strided_slice %59 {offsets = [0, 0], sizes = [32, 32], strides = [1, 1]} : vector<64x32xf32> to vector<32x32xf32>
    %61 = vector.extract_strided_slice %59 {offsets = [32, 0], sizes = [32, 32], strides = [1, 1]} : vector<64x32xf32> to vector<32x32xf32>
    %62 = arith.addf %60, %61 : vector<32x32xf32>
    %63 = arith.mulf %62, %62 : vector<32x32xf32>
    %cst_25 = arith.constant dense<0.000000e+00> : vector<32xf32>
    %64 = vector.multi_reduction <add>, %63, %cst_25 [1] : vector<32x32xf32> to vector<32xf32>
    %65 = vector.shape_cast %64 : vector<32xf32> to vector<32x1xf32>
    %cst_26 = arith.constant 1.000000e+00 : f32
    %66 = vector.broadcast %cst_26 : f32 to vector<32x1xf32>
    %67 = arith.addf %66, %65 : vector<32x1xf32>
    %68 = arith.divf %65, %67 : vector<32x1xf32>
    %cst_27 = arith.constant 9.99999971E-10 : f32
    %69 = vector.broadcast %cst_27 : f32 to vector<32x1xf32>
    %70 = arith.addf %69, %65 : vector<32x1xf32>
    %71 = math.rsqrt %70 : vector<32x1xf32>
    %72 = arith.mulf %68, %71 : vector<32x1xf32>
    %73 = vector.broadcast %72 : vector<32x1xf32> to vector<32x32xf32>
    %74 = arith.mulf %73, %62 : vector<32x32xf32>
    %75 = tpu.concatenate %74, %74 in 0 : vector<32x32xf32>, vector<32x32xf32> -> vector<64x32xf32>
    %76 = arith.mulf %24, %75 : vector<64x32xf32>
    %cst_28 = arith.constant dense<0.000000e+00> : vector<64xf32>
    %77 = vector.multi_reduction <add>, %76, %cst_28 [1] : vector<64x32xf32> to vector<64xf32>
    %78 = vector.shape_cast %77 : vector<64xf32> to vector<64x1xf32>
    %79 = arith.addf %50, %78 : vector<64x1xf32>
    %80 = math.exp %79 : vector<64x1xf32>
    %81 = vector.extract_strided_slice %80 {offsets = [0, 0], sizes = [32, 1], strides = [1, 1]} : vector<64x1xf32> to vector<32x1xf32>
    %82 = vector.extract_strided_slice %80 {offsets = [32, 0], sizes = [32, 1], strides = [1, 1]} : vector<64x1xf32> to vector<32x1xf32>
    %83 = arith.addf %81, %82 : vector<32x1xf32>
    %84 = tpu.concatenate %83, %83 in 0 : vector<32x1xf32>, vector<32x1xf32> -> vector<64x1xf32>
    %85 = tpu.reciprocal %84 {approx = true} : vector<64x1xf32> -> vector<64x1xf32>
    %86 = arith.mulf %80, %85 : vector<64x1xf32>
    %87 = vector.broadcast %86 : vector<64x1xf32> to vector<64x32xf32>
    %88 = arith.mulf %24, %87 : vector<64x32xf32>
    %89 = vector.extract_strided_slice %88 {offsets = [0, 0], sizes = [32, 32], strides = [1, 1]} : vector<64x32xf32> to vector<32x32xf32>
    %90 = vector.extract_strided_slice %88 {offsets = [32, 0], sizes = [32, 32], strides = [1, 1]} : vector<64x32xf32> to vector<32x32xf32>
    %91 = arith.addf %89, %90 : vector<32x32xf32>
    %92 = arith.mulf %91, %91 : vector<32x32xf32>
    %cst_29 = arith.constant dense<0.000000e+00> : vector<32xf32>
    %93 = vector.multi_reduction <add>, %92, %cst_29 [1] : vector<32x32xf32> to vector<32xf32>
    %94 = vector.shape_cast %93 : vector<32xf32> to vector<32x1xf32>
    %cst_30 = arith.constant 1.000000e+00 : f32
    %95 = vector.broadcast %cst_30 : f32 to vector<32x1xf32>
    %96 = arith.addf %95, %94 : vector<32x1xf32>
    %97 = arith.divf %94, %96 : vector<32x1xf32>
    %cst_31 = arith.constant 9.99999971E-10 : f32
    %98 = vector.broadcast %cst_31 : f32 to vector<32x1xf32>
    %99 = arith.addf %98, %94 : vector<32x1xf32>
    %100 = math.rsqrt %99 : vector<32x1xf32>
    %101 = arith.mulf %97, %100 : vector<32x1xf32>
    %102 = vector.broadcast %101 : vector<32x1xf32> to vector<32x32xf32>
    %103 = arith.mulf %102, %91 : vector<32x32xf32>
    %104 = arith.truncf %27 : vector<64x32xf32> to vector<64x32xbf16>
    %105 = arith.truncf %103 : vector<32x32xf32> to vector<32x32xbf16>
    %cst_32 = arith.constant dense<0.000000e+00> : vector<64x32xf32>
    %106 = tpu.matmul %104, %105, %cst_32 {dimension_numbers = #tpu.dot_dimension_numbers<[1], [1], [0], [0], [0, 0, 1, 0], [], []>} : vector<64x32xbf16>, vector<32x32xbf16>, vector<64x32xf32> -> vector<64x32xf32>
    %107 = vector.broadcast %8 : f32 to vector<64x32xf32>
    %108 = arith.mulf %106, %107 : vector<64x32xf32>
    %109 = vector.broadcast %9 : f32 to vector<64x32xf32>
    %110 = arith.addf %108, %109 : vector<64x32xf32>
    %cst_33 = arith.constant 0.000000e+00 : f32
    %111 = vector.broadcast %cst_33 : f32 to vector<64x32xf32>
    %112 = arith.subf %111, %110 : vector<64x32xf32>
    %113 = math.exp %112 : vector<64x32xf32>
    %cst_34 = arith.constant 1.000000e+00 : f32
    %114 = vector.broadcast %cst_34 : f32 to vector<64x32xf32>
    %115 = arith.addf %114, %113 : vector<64x32xf32>
    %cst_35 = arith.constant 1.000000e+00 : f32
    %116 = vector.broadcast %cst_35 : f32 to vector<64x32xf32>
    %117 = arith.divf %116, %115 : vector<64x32xf32>
    %c0_36 = arith.constant 0 : index
    %c0_37 = arith.constant 0 : index
    %c0_38 = arith.constant 0 : index
    %118 = vector.load %arg9[%c0_36, %c0_37, %c0_38] : memref<1x64x32xf32, #tpu.memory_space<vmem>>, vector<1x64x32xf32>
    %119 = vector.shape_cast %118 : vector<1x64x32xf32> to vector<64x32xf32>
    %120 = vector.shape_cast %117 : vector<64x32xf32> to vector<1x64x32xf32>
    tpu.vector_store %arg9[%c0_36, %c0_37, %c0_38], %120 {strides = array<i32>} : memref<1x64x32xf32, #tpu.memory_space<vmem>>, vector<1x64x32xf32>,
    return
  }
  func.func @transform_0(%arg0: i32) -> (i32, i32, i32) {
    %c0_i32 = arith.constant 0 : i32
    %c0_i32_0 = arith.constant 0 : i32
    %c0_i32_1 = arith.constant 0 : i32
    return %arg0, %c0_i32, %c0_i32_0 : i32, i32, i32
  }
  func.func @transform_1(%arg0: i32) -> (i32, i32, i32) {
    %c0_i32 = arith.constant 0 : i32
    %c0_i32_0 = arith.constant 0 : i32
    %c0_i32_1 = arith.constant 0 : i32
    return %arg0, %c0_i32, %c0_i32_0 : i32, i32, i32
  }
  func.func @transform_2(%arg0: i32) -> (i32, i32) {
    %c0_i32 = arith.constant 0 : i32
    %c0_i32_0 = arith.constant 0 : i32
    %c0_i32_1 = arith.constant 0 : i32
    return %c0_i32, %c0_i32_0 : i32, i32
  }
  func.func @transform_3(%arg0: i32) -> (i32, i32) {
    %c0_i32 = arith.constant 0 : i32
    %c0_i32_0 = arith.constant 0 : i32
    %c0_i32_1 = arith.constant 0 : i32
    return %c0_i32, %c0_i32_0 : i32, i32
  }
  func.func @transform_4(%arg0: i32) -> (i32, i32) {
    %c0_i32 = arith.constant 0 : i32
    %c0_i32_0 = arith.constant 0 : i32
    %c0_i32_1 = arith.constant 0 : i32
    return %c0_i32, %c0_i32_0 : i32, i32
  }
  func.func @transform_5(%arg0: i32) -> (i32, i32) {
    %c0_i32 = arith.constant 0 : i32
    %c0_i32_0 = arith.constant 0 : i32
    %c0_i32_1 = arith.constant 0 : i32
    return %c0_i32, %c0_i32_0 : i32, i32
  }
  func.func @transform_6(%arg0: i32) -> i32 {
    %c0_i32 = arith.constant 0 : i32
    %c0_i32_0 = arith.constant 0 : i32
    return %c0_i32 : i32
  }
  func.func @transform_7(%arg0: i32) -> i32 {
    %c0_i32 = arith.constant 0 : i32
    %c0_i32_0 = arith.constant 0 : i32
    return %c0_i32 : i32
  }
  func.func @transform_8(%arg0: i32) -> (i32, i32, i32) {
    %c0_i32 = arith.constant 0 : i32
    %c0_i32_0 = arith.constant 0 : i32
    %c0_i32_1 = arith.constant 0 : i32
    return %arg0, %c0_i32, %c0_i32_0 : i32, i32, i32
  }
}

</mosaic_0001>

<bundles_post_ra>
// kernel: tpu_custom_call.1
= control target key start
LH: loop header
LB: loop body
LE: loop exit
PB: predicated region body
PF: predicated region fallthrough
CT: control target
= control target key end

     0   :  { %vm98_vm0 = vcmask 261120   ;;  %s1537_s4 = inlined_call_operand.vmem [shape: bf16[32,32], index: 4, kind: input, shape index: {}]   ;;  %s1538_s0 = inlined_call_operand.vmem [shape: bf16[1,64,32], index: 0, kind: input, shape index: {}]   ;;  %s1539_s5 = inlined_call_operand.vmem [shape: f32[1,32], index: 5, kind: input, shape index: {}]   ;;  %s1540_s2 = inlined_call_operand.vmem [shape: bf16[32,32], index: 2, kind: input, shape index: {}]   ;;  %s1541_s1 = inlined_call_operand.vmem [shape: bf16[1,64,32], index: 1, kind: input, shape index: {}]   ;;  %s1542_s3 = inlined_call_operand.vmem [shape: f32[1,32], index: 3, kind: input, shape index: {}]   ;;  %s1543_s6 = inlined_call_operand.<no memory space> [shape: f32[1], index: 6, kind: input, shape index: {}]   ;;  %s1544_s7 = inlined_call_operand.<no memory space> [shape: f32[1], index: 7, kind: input, shape index: {}]   ;;  %s1545_s8 = inlined_call_operand.vmem [shape: f32[1,64,32], index: 8, kind: output, shape index: {}]  }
   0x1   :  { %v1025_v0 = vld [vmem:[%s1537_s4 + $0x8] sm:$0xff]   ;;  %v1026_v1 = vld [vmem:[%s1537_s4] sm:$0xff]   ;;  %v1029_v4 = vld [vmem:[%s1538_s0 + $0x10] sm:$0xff]  }
   0x2   :  { %978 = vmatprep.subr.bf16.mxu0 %v1025_v0  ;;  %v1027_v2 = vld [vmem:[%s1538_s0] sm:$0xff]   ;;  %v1028_v3 = vld [vmem:[%s1538_s0 + $0x8] sm:$0xff]   ;;  %v1030_v5 = vld [vmem:[%s1538_s0 + $0x18] sm:$0xff]  }
   0x3   :  { %979 = vmatpush3.bf16.msra.mxu0 %v1025_v0  ;;  %982 = vmatprep.mubr.msk.bf16.mxu0 %vm98_vm0, %v1027_v2  ;;  %v934_v6 = vld [vmem:[%s1539_s5] ss:$0 sm:$0xff] }
   0x4   :  { %980 = vmatprep.subr.bf16.mxu0 %v1026_v1 }
   0x7   :  { %981 = vmatpush3.bf16.msra.mxu0 %v1026_v1 }
   0xa   :  { %983 = vmatmul.mubr.msk.bf16.vlgmr.msra.gmra.mxu0 %vm98_vm0, %v1028_v3 }
   0xb   :  { %986 = vmatprep.mubr.msk.bf16.mxu0 %vm98_vm0, %v1029_v4 }
  0x12   :  { %987 = vmatmul.mubr.msk.bf16.gmra.mxu0 %vm98_vm0, %v1030_v5 }
  0xca   :  { %v984_v7 = vpop.f32.mrf.mxu0 }
  0xcb   :  { %v1268_v8 = vadd.f32 %v984_v7, %v934_v6 }
  0xcc   :  { %v145_v9 = vpop.f32.mrf.mxu0 }
  0xcd   :  { %v178_v10 = vmul.f32 %v1268_v8, %v1268_v8  ;;  %v1272_v12 = vadd.f32 %v934_v6, %v145_v9 }
  0xce   :  { %v985_v11 = vpop.f32.mrf.mxu0 }
  0xcf   :  { %v1274_v13 = vadd.f32 %v985_v11, %v934_v6  ;;  %v190_v14 = vsel %vm98_vm0, %v178_v10, 0.0  ;;  %v176_v20 = vmul.f32 %v1272_v12, %v1272_v12 }
  0xd0   :  { %191 = vadd.xlane.f32.xlu0 %v190_v14  ;;  %v148_v15 = vpop.f32.mrf.mxu0 }
  0xd1   :  { %v179_v16 = vmul.f32 %v1274_v13, %v1274_v13  ;;  %v1288_v24 = vadd.f32 %v934_v6, %v148_v15  ;;  %v184_v28 = vsel %vm98_vm0, %v176_v20, 0.0 }
  0xd2   :  { %v988_v17 = vpop.f32.mrf.mxu0 }
  0xd3   :  { %v1279_v18 = vadd.f32 %v988_v17, %v934_v6  ;;  %v193_v19 = vsel %vm98_vm0, %v179_v16, 0.0  ;;  %v177_v35 = vmul.f32 %v1288_v24, %v1288_v24 }
  0xd4   :  { %194 = vadd.xlane.f32.xlu0 %v193_v19  ;;  %v161_v21 = vpop.f32.mrf.mxu0 }
  0xd5   :  { %v1284_v22 = vadd.f32 %v934_v6, %v161_v21  ;;  %v182_v23 = vmul.f32 %v1279_v18, %v1279_v18  ;;  %v187_v36 = vsel %vm98_vm0, %v177_v35, 0.0 }
  0xd6   :  { %v989_v25 = vpop.f32.mrf.mxu0 }
  0xd7   :  { %v1290_v26 = vadd.f32 %v989_v25, %v934_v6  ;;  %v202_v27 = vsel %vm98_vm0, %v182_v23, 0.0  ;;  %v180_v29 = vmul.f32 %v1284_v22, %v1284_v22 }
  0xd8   :  { %203 = vadd.xlane.f32.xlu1 %v202_v27  ;;  %v164_v30 = vpop.f32.mrf.mxu0  ;;  %185 = vadd.xlane.f32.xlu0 %v184_v28 }
  0xd9   :  { %v183_v31 = vmul.f32 %v1290_v26, %v1290_v26  ;;  %v1298_v32 = vadd.f32 %v934_v6, %v164_v30  ;;  %v196_v34 = vsel %vm98_vm0, %v180_v29, 0.0 }
  0xdb   :  { %v205_v33 = vsel %vm98_vm0, %v183_v31, 0.0  ;;  %v181_v37 = vmul.f32 %v1298_v32, %v1298_v32 }
  0xdc   :  { %206 = vadd.xlane.f32.xlu1 %v205_v33  ;;  %197 = vadd.xlane.f32.xlu0 %v196_v34 }
  0xdd   :  { %v199_v38 = vsel %vm98_vm0, %v181_v37, 0.0 }
  0xe0   :  { %188 = vadd.xlane.f32.xlu1 %v187_v36 }
  0xe4   :  { %200 = vadd.xlane.f32.xlu1 %v199_v38 }
 0x159   :  { %v192_v39 = vpop.xlane.xlu0 %191 }
 0x15a   :  { %v210_v40 = vadd.f32 1.0, %v192_v39  ;;  %v234_v42 = vadd.f32 1e-09, %v192_v39 }
 0x15c   :  { %1037 = vrcp.f32 %v210_v40 }
 0x15d   :  { %v195_v41 = vpop.xlane.xlu0 %194 }
 0x15e   :  { %v211_v43 = vadd.f32 1.0, %v195_v41  ;;  %v235_v44 = vadd.f32 1e-09, %v195_v41 }
 0x160   :  { %1039 = vrcp.f32 %v211_v43 }
 0x161   :  { %v204_v45 = vpop.xlane.xlu1 %203  ;;  %v186_v46 = vpop.xlane.xlu0 %185  ;;  %1041 = vrsqrt.f32 %v234_v42 }
 0x162   :  { %v214_v47 = vadd.f32 1.0, %v204_v45  ;;  %v238_v48 = vadd.f32 1e-09, %v204_v45  ;;  %v208_v49 = vadd.f32 1.0, %v186_v46  ;;  %1043 = vrsqrt.f32 %v235_v44 }
 0x163   :  { %v232_v50 = vadd.f32 1e-09, %v186_v46 }
 0x164   :  { %1045 = vrcp.f32 %v214_v47 }
 0x165   :  { %1047 = vrsqrt.f32 %v238_v48  ;;  %v207_v51 = vpop.xlane.xlu1 %206  ;;  %v198_v52 = vpop.xlane.xlu0 %197 }
 0x166   :  { %1049 = vrcp.f32 %v208_v49  ;;  %v215_v53 = vadd.f32 1.0, %v207_v51  ;;  %v239_v54 = vadd.f32 1e-09, %v207_v51  ;;  %v212_v55 = vadd.f32 1.0, %v198_v52 }
 0x167   :  { %1051 = vrsqrt.f32 %v232_v50  ;;  %v236_v56 = vadd.f32 1e-09, %v198_v52 }
 0x168   :  { %1053 = vrcp.f32 %v215_v53 }
 0x169   :  { %1055 = vrsqrt.f32 %v239_v54  ;;  %v189_v57 = vpop.xlane.xlu1 %188  ;;  %v1038_v59 = vpop.eup %1037 }
 0x16a   :  { %1057 = vrcp.f32 %v212_v55  ;;  %v209_v58 = vadd.f32 1.0, %v189_v57  ;;  %v233_v60 = vadd.f32 1e-09, %v189_v57  ;;  %v221_v63 = vmul.f32 %v1038_v59, %v192_v39 }
 0x16b   :  { %1059 = vrsqrt.f32 %v236_v56 }
 0x16c   :  { %1061 = vrcp.f32 %v209_v58 }
 0x16d   :  { %v201_v61 = vpop.xlane.xlu1 %200  ;;  %v1040_v62 = vpop.eup %1039  ;;  %1063 = vrsqrt.f32 %v233_v60 }
 0x16e   :  { %v213_v0 = vadd.f32 1.0, %v201_v61  ;;  %v237_v1 = vadd.f32 1e-09, %v201_v61  ;;  %v1042_v2 = vpop.eup %1041  ;;  %v223_v5 = vmul.f32 %v1040_v62, %v195_v41 }
 0x16f   :  { %v1044_v3 = vpop.eup %1043  ;;  %v250_v7 = vmul.f32 %v1042_v2, %v221_v63 }
 0x170   :  { %1065 = vrcp.f32 %v213_v0  ;;  %v251_v16 = vmul.f32 %v1044_v3, %v223_v5 }
 0x171   :  { %v1046_v4 = vpop.eup %1045  ;;  %1067 = vrsqrt.f32 %v237_v1  ;;  %v1309_v20 = vmul.f32 %v250_v7, %v1268_v8 }
 0x172   :  { %v1048_v6 = vpop.eup %1047  ;;  %v229_v9 = vmul.f32 %v1046_v4, %v204_v45  ;;  %v1317_v33 = vmul.f32 %v251_v16, %v1274_v13 }
 0x173   :  { %v1050_v10 = vpop.eup %1049 }
 0x174   :  { %v1052_v11 = vpop.eup %1051  ;;  %v254_v14 = vmul.f32 %v1048_v6, %v229_v9  ;;  %v217_v17 = vmul.f32 %v1050_v10, %v186_v46 }
 0x175   :  { %v1054_v15 = vpop.eup %1053 }
 0x176   :  { %v1056_v19 = vpop.eup %1055  ;;  %v1312_v21 = vmul.f32 %v254_v14, %v1279_v18  ;;  %v231_v23 = vmul.f32 %v1054_v15, %v207_v51  ;;  %v248_v34 = vmul.f32 %v1052_v11, %v217_v17 }
 0x177   :  { %v1058_v25 = vpop.eup %1057 }
 0x178   :  { %v1060_v27 = vpop.eup %1059  ;;  %v255_v28 = vmul.f32 %v1056_v19, %v231_v23  ;;  %v225_v29 = vmul.f32 %v1058_v25, %v198_v52  ;;  %v381_v30 = vadd.f32 %v1312_v21, %v1309_v20  ;;  %v1328_v42 = vmul.f32 %v248_v34, %v1272_v12 }
 0x179   :  { %v1062_v31 = vpop.eup %1061 }
 0x17a   :  { %v1320_v35 = vmul.f32 %v255_v28, %v1290_v26  ;;  %v252_v8 = vmul.f32 %v1060_v27, %v225_v29  ;;  %v219_v36 = vmul.f32 %v1062_v31, %v189_v57  ;;  %v385_v18 = vmul.f32 0.5, %v381_v30  ;;  %v1064_v37 = vpop.eup %1063 }
 0x17c   :  { %v1323_v38 = vmul.f32 %v252_v8, %v1284_v22  ;;  %v389_v39 = vmul.f32 %v385_v18, %v385_v18  ;;  %v382_v40 = vadd.f32 %v1320_v35, %v1317_v33  ;;  %v249_v13 = vmul.f32 %v1064_v37, %v219_v36 }
 0x17d   :  { %v1066_v41 = vpop.eup %1065 }
 0x17e   :  { %v227_v43 = vmul.f32 %v1066_v41, %v201_v61  ;;  %v397_v26 = vsel %vm98_vm0, %v389_v39, 0.0  ;;  %v386_v44 = vmul.f32 0.5, %v382_v40  ;;  %v1068_v45 = vpop.eup %1067  ;;  %v379_v46 = vadd.f32 %v1323_v38, %v1328_v42 }
 0x17f   :  { %398 = vadd.xlane.f32.xlu0 %v397_v26  ;;  %v1334_v49 = vmul.f32 %v249_v13, %v1288_v24 }
 0x180   :  { %v253_v22 = vmul.f32 %v1068_v45, %v227_v43  ;;  %v390_v47 = vmul.f32 %v386_v44, %v386_v44  ;;  %v383_v48 = vmul.f32 0.5, %v379_v46 }
 0x182   :  { %v1337_v50 = vmul.f32 %v253_v22, %v1298_v32  ;;  %v400_v12 = vsel %vm98_vm0, %v390_v47, 0.0  ;;  %v387_v51 = vmul.f32 %v383_v48, %v383_v48 }
 0x183   :  { %401 = vadd.xlane.f32.xlu1 %v400_v12 }
 0x184   :  { %v380_v52 = vadd.f32 %v1337_v50, %v1334_v49  ;;  %v391_v53 = vsel %vm98_vm0, %v387_v51, 0.0 }
 0x185   :  { %392 = vadd.xlane.f32.xlu0 %v391_v53 }
 0x186   :  { %v384_v54 = vmul.f32 0.5, %v380_v52 }
 0x188   :  { %v388_v55 = vmul.f32 %v384_v54, %v384_v54 }
 0x18a   :  { %v394_v56 = vsel %vm98_vm0, %v388_v55, 0.0 }
 0x18b   :  { %395 = vadd.xlane.f32.xlu1 %v394_v56 }
 0x208   :  { %v399_v24 = vpop.xlane.xlu0 %398 }
 0x209   :  { %v405_v57 = vadd.f32 1.0, %v399_v24  ;;  %v417_v58 = vadd.f32 1e-09, %v399_v24 }
 0x20b   :  { %1069 = vrcp.f32 %v405_v57 }
 0x20c   :  { %v402_v32 = vpop.xlane.xlu1 %401  ;;  %1071 = vrsqrt.f32 %v417_v58 }
 0x20d   :  { %v406_v59 = vadd.f32 1.0, %v402_v32  ;;  %v418_v60 = vadd.f32 1e-09, %v402_v32 }
 0x20e   :  { %v393_v61 = vpop.xlane.xlu0 %392 }
 0x20f   :  { %1073 = vrcp.f32 %v406_v59  ;;  %v403_v62 = vadd.f32 1.0, %v393_v61  ;;  %v415_v63 = vadd.f32 1e-09, %v393_v61 }
 0x210   :  { %1075 = vrsqrt.f32 %v418_v60 }
 0x211   :  { %1077 = vrcp.f32 %v403_v62 }
 0x212   :  { %1079 = vrsqrt.f32 %v415_v63 }
 0x214   :  { %v396_v0 = vpop.xlane.xlu1 %395 }
 0x215   :  { %v404_v1 = vadd.f32 1.0, %v396_v0  ;;  %v416_v2 = vadd.f32 1e-09, %v396_v0 }
 0x217   :  { %1081 = vrcp.f32 %v404_v1 }
 0x218   :  { %v1070_v3 = vpop.eup %1069  ;;  %1083 = vrsqrt.f32 %v416_v2 }
 0x219   :  { %v412_v4 = vmul.f32 %v1070_v3, %v399_v24  ;;  %v1072_v5 = vpop.eup %1071 }
 0x21b   :  { %v425_v6 = vmul.f32 %v1072_v5, %v412_v4 }
 0x21c   :  { %v1074_v7 = vpop.eup %1073 }
 0x21d   :  { %v414_v9 = vmul.f32 %v1074_v7, %v402_v32  ;;  %v429_v10 = vmul.f32 %v425_v6, %v385_v18  ;;  %v1076_v11 = vpop.eup %1075 }
 0x21e   :  { %v1078_v14 = vpop.eup %1077 }
 0x21f   :  { %v426_v15 = vmul.f32 %v1076_v11, %v414_v9  ;;  %v433_v16 = vmul.f32 %v429_v10, %v1309_v20  ;;  %v408_v17 = vmul.f32 %v1078_v14, %v393_v61  ;;  %v1080_v19 = vpop.eup %1079  ;;  %v437_v27 = vmul.f32 %v429_v10, %v1312_v21 }
 0x221   :  { %v445_v23 = vsel %vm98_vm0, %v433_v16, 0.0  ;;  %v430_v25 = vmul.f32 %v426_v15, %v386_v44  ;;  %v423_v28 = vmul.f32 %v1080_v19, %v408_v17  ;;  %v457_v36 = vsel %vm98_vm0, %v437_v27, 0.0 }
 0x222   :  { %446 = vadd.xlane.f32.xlu0 %v445_v23 }
 0x223   :  { %v434_v29 = vmul.f32 %v430_v25, %v1317_v33  ;;  %v427_v31 = vmul.f32 %v423_v28, %v383_v48  ;;  %v438_v18 = vmul.f32 %v430_v25, %v1320_v35  ;;  %v1197_v48 = vmov 0  }
 0x224   :  { %v1082_v30 = vpop.eup %1081  ;;  %1024 = vset.pattern.permute.xlu1 %v1197_v48  ;;  %1023 = vset.pattern.permute.xlu0 %v1197_v48 }
 0x225   :  { %v410_v34 = vmul.f32 %v1082_v30, %v396_v0  ;;  %v448_v8 = vsel %vm98_vm0, %v434_v29, 0.0  ;;  %v1084_v37 = vpop.eup %1083  ;;  %v431_v39 = vmul.f32 %v427_v31, %v1328_v42  ;;  %v460_v41 = vsel %vm98_vm0, %v438_v18, 0.0 }
 0x226   :  { %449 = vadd.xlane.f32.xlu1 %v448_v8  ;;  %458 = vadd.xlane.f32.xlu0 %v457_v36  ;;  %v435_v26 = vmul.f32 %v427_v31, %v1323_v38 }
 0x227   :  { %v424_v40 = vmul.f32 %v1084_v37, %v410_v34  ;;  %v439_v13 = vsel %vm98_vm0, %v431_v39, 0.0 }
 0x228   :  { %v451_v46 = vsel %vm98_vm0, %v435_v26, 0.0 }
 0x229   :  { %v428_v43 = vmul.f32 %v424_v40, %v384_v54 }
 0x22a   :  { %461 = vadd.xlane.f32.xlu1 %v460_v41  ;;  %440 = vadd.xlane.f32.xlu0 %v439_v13 }
 0x22b   :  { %v432_v44 = vmul.f32 %v428_v43, %v1334_v49  ;;  %v436_v22 = vmul.f32 %v428_v43, %v1337_v50 }
 0x22d   :  { %v442_v45 = vsel %vm98_vm0, %v432_v44, 0.0  ;;  %v454_v47 = vsel %vm98_vm0, %v436_v22, 0.0 }
 0x22e   :  { %443 = vadd.xlane.f32.xlu1 %v442_v45  ;;  %452 = vadd.xlane.f32.xlu0 %v451_v46 }
 0x232   :  { %455 = vadd.xlane.f32.xlu1 %v454_v47 }
 0x2ab   :  { %v1360_v12 = vpop.xlane.xlu0 %446 }
 0x2ac   :  { %v475_v51 = vmul.f32 1.442695, %v1360_v12 }
 0x2ae   :  { %1085 = vpow2.f32 %v475_v51 }
 0x2af   :  { %v1363_v52 = vpop.xlane.xlu1 %449  ;;  %v1365_v53 = vpop.xlane.xlu0 %458 }
 0x2b0   :  { %v483_v54 = vmul.f32 1.442695, %v1365_v53  ;;  %v477_v60 = vmul.f32 1.442695, %v1363_v52 }
 0x2b2   :  { %1087 = vpow2.f32 %v483_v54 }
 0x2b3   :  { %v1368_v55 = vpop.xlane.xlu1 %461  ;;  %v1370_v56 = vpop.xlane.xlu0 %440 }
 0x2b4   :  { %v471_v24 = vmul.f32 1.442695, %v1370_v56  ;;  %v485_v59 = vmul.f32 1.442695, %v1368_v55 }
 0x2b6   :  { %1089 = vpow2.f32 %v471_v24 }
 0x2b7   :  { %v1373_v57 = vpop.xlane.xlu0 %452  ;;  %v1375_v58 = vpop.xlane.xlu1 %443 }
 0x2b8   :  { %v479_v32 = vmul.f32 1.442695, %v1373_v57  ;;  %v473_v2 = vmul.f32 1.442695, %v1375_v58 }
 0x2ba   :  { %1091 = vpow2.f32 %v479_v32 }
 0x2bb   :  { %1093 = vpow2.f32 %v485_v59  ;;  %v1380_v61 = vpop.xlane.xlu1 %455  ;;  %v1086_v62 = vpop.eup %1085 }
 0x2bc   :  { %1095 = vpow2.f32 %v477_v60  ;;  %v481_v1 = vmul.f32 1.442695, %v1380_v61 }
 0x2bf   :  { %v1088_v63 = vpop.eup %1087 }
 0x2c0   :  { %v489_v0 = vadd.f32 %v1088_v63, %v1086_v62 }
 0x2c2   :  { %1097 = vrcp.f32 %v489_v0 }
 0x2c3   :  { %1099 = vpow2.f32 %v481_v1  ;;  %v1090_v3 = vpop.eup %1089 }
 0x2c4   :  { %1101 = vpow2.f32 %v473_v2 }
 0x2c7   :  { %v1092_v4 = vpop.eup %1091 }
 0x2c8   :  { %v487_v5 = vadd.f32 %v1092_v4, %v1090_v3  ;;  %v1094_v6 = vpop.eup %1093 }
 0x2c9   :  { %v1096_v7 = vpop.eup %1095 }
 0x2ca   :  { %1103 = vrcp.f32 %v487_v5  ;;  %v490_v9 = vadd.f32 %v1096_v7, %v1094_v6 }
 0x2cc   :  { %1105 = vrcp.f32 %v490_v9 }
 0x2cf   :  { %v1098_v10 = vpop.eup %1097 }
 0x2d0   :  { %v501_v11 = vmul.f32 %v1098_v10, %v1088_v63  ;;  %v497_v14 = vmul.f32 %v1098_v10, %v1086_v62  ;;  %v1100_v15 = vpop.eup %1099 }
 0x2d1   :  { %v1102_v16 = vpop.eup %1101 }
 0x2d2   :  { %535 = vperm.xlu1 %1024, %v501_v11   ;;  %515 = vperm.xlu0 %1023, %v497_v14   ;;  %v488_v17 = vadd.f32 %v1102_v16, %v1100_v15 }
 0x2d4   :  { %1107 = vrcp.f32 %v488_v17 }
 0x2d7   :  { %v1104_v19 = vpop.eup %1103 }
 0x2d8   :  { %v495_v23 = vmul.f32 %v1104_v19, %v1090_v3  ;;  %v499_v25 = vmul.f32 %v1104_v19, %v1092_v4 }
 0x2d9   :  { %v1106_v27 = vpop.eup %1105 }
 0x2da   :  { %505 = vperm.xlu1 %1024, %v495_v23   ;;  %v498_v28 = vmul.f32 %v1106_v27, %v1096_v7  ;;  %v502_v29 = vmul.f32 %v1106_v27, %v1094_v6 }
 0x2de   :  { %525 = vperm.xlu1 %1024, %v499_v25  }
 0x2e1   :  { %v1108_v30 = vpop.eup %1107 }
 0x2e2   :  { %520 = vperm.xlu1 %1024, %v498_v28   ;;  %v496_v31 = vmul.f32 %v1108_v30, %v1102_v16  ;;  %v500_v34 = vmul.f32 %v1108_v30, %v1100_v15 }
 0x2e6   :  { %540 = vperm.xlu1 %1024, %v502_v29  }
 0x2ea   :  { %510 = vperm.xlu1 %1024, %v496_v31  }
 0x2ee   :  { %530 = vperm.xlu1 %1024, %v500_v34  }
 0x34d   :  { %v536_v8 = vpop.permute.xlu1 %535  ;;  %v516_v36 = vpop.permute.xlu0 %515 }
 0x34e   :  { %v549_v18 = vmul.f32 %v536_v8, %v1312_v21  ;;  %v545_v37 = vmul.f32 %v516_v36, %v1309_v20 }
 0x350   :  { %v553_v39 = vadd.f32 %v549_v18, %v545_v37 }
 0x352   :  { %v557_v40 = vmul.f32 %v553_v39, %v553_v39 }
 0x354   :  { %v565_v41 = vsel %vm98_vm0, %v557_v40, 0.0 }
 0x355   :  { %v506_v13 = vpop.permute.xlu1 %505  ;;  %566 = vadd.xlane.f32.xlu1 %v565_v41 }
 0x356   :  { %v543_v46 = vmul.f32 %v506_v13, %v1328_v42 }
 0x359   :  { %v526_v43 = vpop.permute.xlu1 %525 }
 0x35a   :  { %v547_v44 = vmul.f32 %v526_v43, %v1323_v38 }
 0x35c   :  { %v551_v48 = vadd.f32 %v547_v44, %v543_v46 }
 0x35d   :  { %v521_v26 = vpop.permute.xlu1 %520 }
 0x35e   :  { %v546_v22 = vmul.f32 %v521_v26, %v1317_v33  ;;  %v555_v59 = vmul.f32 %v551_v48, %v551_v48 }
 0x360   :  { %v559_v1 = vsel %vm98_vm0, %v555_v59, 0.0 }
 0x361   :  { %v541_v45 = vpop.permute.xlu1 %540 }
 0x362   :  { %v550_v47 = vmul.f32 %v541_v45, %v1320_v35 }
 0x364   :  { %v554_v51 = vadd.f32 %v550_v47, %v546_v22 }
 0x365   :  { %v511_v54 = vpop.permute.xlu1 %510 }
 0x366   :  { %v558_v24 = vmul.f32 %v554_v51, %v554_v51  ;;  %v544_v62 = vmul.f32 %v511_v54, %v1334_v49 }
 0x368   :  { %v568_v32 = vsel %vm98_vm0, %v558_v24, 0.0 }
 0x369   :  { %569 = vadd.xlane.f32.xlu0 %v568_v32  ;;  %v531_v60 = vpop.permute.xlu1 %530 }
 0x36a   :  { %v548_v63 = vmul.f32 %v531_v60, %v1337_v50 }
 0x36c   :  { %v552_v0 = vadd.f32 %v548_v63, %v544_v62 }
 0x36d   :  { %560 = vadd.xlane.f32.xlu0 %v559_v1 }
 0x36e   :  { %v556_v2 = vmul.f32 %v552_v0, %v552_v0 }
 0x370   :  { %v562_v3 = vsel %vm98_vm0, %v556_v2, 0.0 }
 0x371   :  { %563 = vadd.xlane.f32.xlu1 %v562_v3 }
 0x3de   :  { %v567_v4 = vpop.xlane.xlu1 %566 }
 0x3df   :  { %v573_v5 = vadd.f32 1.0, %v567_v4  ;;  %v585_v6 = vadd.f32 1e-09, %v567_v4 }
 0x3e1   :  { %1109 = vrcp.f32 %v573_v5  ;;  %v1032_v5 = vld [vmem:[%s1540_s2] sm:$0xff]  }
 0x3e2   :  { %1111 = vrsqrt.f32 %v585_v6  ;;  %v1033_v6 = vld [vmem:[%s1541_s1] sm:$0xff]  }
 0x3e3   :  { %994 = vmatprep.mubr.msk.bf16.mxu1 %vm98_vm0, %v1033_v6 }
 0x3ee   :  { %v1110_v7 = vpop.eup %1109 }
 0x3ef   :  { %v580_v9 = vmul.f32 %v1110_v7, %v567_v4  ;;  %v1112_v10 = vpop.eup %1111  ;;  %v1034_v7 = vld [vmem:[%s1541_s1 + $0x8] sm:$0xff]  }
 0x3f1   :  { %v593_v11 = vmul.f32 %v1112_v10, %v580_v9  ;;  %v1035_v9 = vld [vmem:[%s1541_s1 + $0x10] sm:$0xff]  }
 0x3f2   :  { %v570_v14 = vpop.xlane.xlu0 %569 }
 0x3f3   :  { %v574_v15 = vadd.f32 1.0, %v570_v14  ;;  %v586_v16 = vadd.f32 1e-09, %v570_v14  ;;  %v597_v17 = vmul.f32 %v593_v11, %v553_v39 }
 0x3f5   :  { %1113 = vrcp.f32 %v574_v15  ;;  %v601_v19 = vmul.f32 %v597_v17, %v1309_v20  ;;  %v605_v25 = vmul.f32 %v597_v17, %v1312_v21 }
 0x3f6   :  { %v561_v23 = vpop.xlane.xlu0 %560  ;;  %1115 = vrsqrt.f32 %v586_v16 }
 0x3f7   :  { %v571_v27 = vadd.f32 1.0, %v561_v23  ;;  %v583_v28 = vadd.f32 1e-09, %v561_v23  ;;  %v613_v29 = vsel %vm98_vm0, %v601_v19, 0.0  ;;  %v625_v8 = vsel %vm98_vm0, %v605_v25, 0.0 }
 0x3f8   :  { %614 = vadd.xlane.f32.xlu0 %v613_v29 }
 0x3f9   :  { %1117 = vrcp.f32 %v571_v27 }
 0x3fa   :  { %v564_v30 = vpop.xlane.xlu1 %563  ;;  %1119 = vrsqrt.f32 %v583_v28 }
 0x3fb   :  { %v572_v31 = vadd.f32 1.0, %v564_v30  ;;  %v584_v34 = vadd.f32 1e-09, %v564_v30 }
 0x3fc   :  { %626 = vadd.xlane.f32.xlu0 %v625_v8 }
 0x3fd   :  { %1121 = vrcp.f32 %v572_v31 }
 0x3fe   :  { %1123 = vrsqrt.f32 %v584_v34 }
 0x402   :  { %v1114_v36 = vpop.eup %1113 }
 0x403   :  { %v582_v18 = vmul.f32 %v1114_v36, %v570_v14  ;;  %v1116_v37 = vpop.eup %1115 }
 0x405   :  { %v594_v39 = vmul.f32 %v1116_v37, %v582_v18 }
 0x406   :  { %v1118_v40 = vpop.eup %1117 }
 0x407   :  { %v576_v41 = vmul.f32 %v1118_v40, %v561_v23  ;;  %v598_v13 = vmul.f32 %v594_v39, %v554_v51  ;;  %v1120_v43 = vpop.eup %1119 }
 0x409   :  { %v591_v26 = vmul.f32 %v1120_v43, %v576_v41  ;;  %v602_v44 = vmul.f32 %v598_v13, %v1317_v33  ;;  %v606_v47 = vmul.f32 %v598_v13, %v1320_v35 }
 0x40a   :  { %v1122_v45 = vpop.eup %1121 }
 0x40b   :  { %v578_v46 = vmul.f32 %v1122_v45, %v564_v30  ;;  %v616_v22 = vsel %vm98_vm0, %v602_v44, 0.0  ;;  %v595_v54 = vmul.f32 %v591_v26, %v551_v48  ;;  %v1124_v24 = vpop.eup %1123  ;;  %v628_v60 = vsel %vm98_vm0, %v606_v47, 0.0 }
 0x40c   :  { %617 = vadd.xlane.f32.xlu1 %v616_v22 }
 0x40d   :  { %v592_v32 = vmul.f32 %v1124_v24, %v578_v46  ;;  %v599_v59 = vmul.f32 %v595_v54, %v1328_v42  ;;  %v603_v63 = vmul.f32 %v595_v54, %v1323_v38 }
 0x40f   :  { %v607_v51 = vsel %vm98_vm0, %v599_v59, 0.0  ;;  %v596_v62 = vmul.f32 %v592_v32, %v552_v0  ;;  %v619_v48 = vsel %vm98_vm0, %v603_v63, 0.0  ;;  %v1031_v0 = vld [vmem:[%s1540_s2 + $0x8] sm:$0xff]  }
 0x410   :  { %629 = vadd.xlane.f32.xlu1 %v628_v60  ;;  %608 = vadd.xlane.f32.xlu0 %v607_v51 }
 0x411   :  { %v600_v1 = vmul.f32 %v596_v62, %v1334_v49  ;;  %v604_v3 = vmul.f32 %v596_v62, %v1337_v50  ;;  %990 = vmatprep.subr.bf16.mxu1 %v1031_v0 }
 0x412   :  { %991 = vmatpush3.bf16.msra.mxu1 %v1031_v0 }
 0x413   :  { %v610_v2 = vsel %vm98_vm0, %v600_v1, 0.0  ;;  %v622_v4 = vsel %vm98_vm0, %v604_v3, 0.0  ;;  %992 = vmatprep.subr.bf16.mxu1 %v1032_v5 }
 0x414   :  { %611 = vadd.xlane.f32.xlu1 %v610_v2  ;;  %620 = vadd.xlane.f32.xlu0 %v619_v48 }
 0x416   :  { %993 = vmatpush3.bf16.msra.mxu1 %v1032_v5 }
 0x418   :  { %623 = vadd.xlane.f32.xlu1 %v622_v4 }
 0x419   :  { %995 = vmatmul.mubr.msk.bf16.vlgmr.msra.gmra.mxu1 %vm98_vm0, %v1034_v7 }
 0x41a   :  { %998 = vmatprep.mubr.msk.bf16.mxu1 %vm98_vm0, %v1035_v9 }
 0x481   :  { %v615_v10 = vpop.xlane.xlu0 %614 }
 0x482   :  { %v633_v11 = vadd.f32 %v615_v10, %v1360_v12 }
 0x484   :  { %v643_v14 = vmul.f32 1.442695, %v633_v11 }
 0x485   :  { %v627_v15 = vpop.xlane.xlu0 %626 }
 0x486   :  { %v637_v16 = vadd.f32 %v627_v15, %v1365_v53  ;;  %1125 = vpow2.f32 %v643_v14 }
 0x488   :  { %v651_v17 = vmul.f32 1.442695, %v637_v16 }
 0x48a   :  { %1127 = vpow2.f32 %v651_v17 }
 0x493   :  { %v1126_v23 = vpop.eup %1125 }
 0x495   :  { %v618_v19 = vpop.xlane.xlu1 %617 }
 0x496   :  { %v634_v25 = vadd.f32 %v618_v19, %v1363_v52 }
 0x497   :  { %v1128_v27 = vpop.eup %1127 }
 0x498   :  { %v657_v28 = vadd.f32 %v1128_v27, %v1126_v23  ;;  %v645_v29 = vmul.f32 1.442695, %v634_v25 }
 0x499   :  { %v630_v30 = vpop.xlane.xlu1 %629  ;;  %v609_v31 = vpop.xlane.xlu0 %608 }
 0x49a   :  { %1129 = vrcp.f32 %v657_v28  ;;  %v638_v34 = vadd.f32 %v630_v30, %v1368_v55  ;;  %v631_v12 = vadd.f32 %v609_v31, %v1370_v56  ;;  %v1036_v56 = vld [vmem:[%s1541_s1 + $0x18] sm:$0xff]  }
 0x49b   :  { %1131 = vpow2.f32 %v645_v29  ;;  %999 = vmatmul.mubr.msk.bf16.gmra.mxu1 %vm98_vm0, %v1036_v56 }
 0x49c   :  { %v653_v8 = vmul.f32 1.442695, %v638_v34  ;;  %v639_v18 = vmul.f32 1.442695, %v631_v12 }
 0x49d   :  { %v612_v53 = vpop.xlane.xlu1 %611  ;;  %v621_v36 = vpop.xlane.xlu0 %620 }
 0x49e   :  { %1133 = vpow2.f32 %v653_v8  ;;  %v632_v37 = vadd.f32 %v612_v53, %v1375_v58  ;;  %v635_v52 = vadd.f32 %v621_v36, %v1373_v57 }
 0x49f   :  { %1135 = vpow2.f32 %v639_v18 }
 0x4a0   :  { %v647_v39 = vmul.f32 1.442695, %v635_v52  ;;  %v641_v40 = vmul.f32 1.442695, %v632_v37 }
 0x4a1   :  { %v624_v41 = vpop.xlane.xlu1 %623 }
 0x4a2   :  { %v636_v13 = vadd.f32 %v624_v41, %v1380_v61  ;;  %1137 = vpow2.f32 %v647_v39 }
 0x4a3   :  { %1139 = vpow2.f32 %v641_v40 }
 0x4a4   :  { %v649_v55 = vmul.f32 1.442695, %v636_v13 }
 0x4a6   :  { %1141 = vpow2.f32 %v649_v55 }
 0x4a7   :  { %v1130_v43 = vpop.eup %1129 }
 0x4a8   :  { %v669_v26 = vmul.f32 %v1130_v43, %v1128_v27  ;;  %v665_v44 = vmul.f32 %v1130_v43, %v1126_v23  ;;  %v1132_v57 = vpop.eup %1131 }
 0x4aa   :  { %703 = vperm.xlu1 %1024, %v669_v26   ;;  %683 = vperm.xlu0 %1023, %v665_v44  }
 0x4ab   :  { %v1134_v58 = vpop.eup %1133 }
 0x4ac   :  { %v658_v45 = vadd.f32 %v1134_v58, %v1132_v57  ;;  %v1136_v61 = vpop.eup %1135 }
 0x4ae   :  { %1143 = vrcp.f32 %v658_v45 }
 0x4af   :  { %v1138_v46 = vpop.eup %1137 }
 0x4b0   :  { %v655_v22 = vadd.f32 %v1138_v46, %v1136_v61  ;;  %v1140_v47 = vpop.eup %1139 }
 0x4b2   :  { %1145 = vrcp.f32 %v655_v22 }
 0x4b3   :  { %v1142_v54 = vpop.eup %1141 }
 0x4b4   :  { %v656_v24 = vadd.f32 %v1142_v54, %v1140_v47 }
 0x4b6   :  { %1147 = vrcp.f32 %v656_v24 }
 0x4bb   :  { %v1144_v32 = vpop.eup %1143 }
 0x4bc   :  { %v666_v59 = vmul.f32 %v1144_v32, %v1132_v57  ;;  %v670_v60 = vmul.f32 %v1144_v32, %v1134_v58 }
 0x4be   :  { %688 = vperm.xlu1 %1024, %v666_v59   ;;  %708 = vperm.xlu0 %1023, %v670_v60  }
 0x4bf   :  { %v1146_v51 = vpop.eup %1145 }
 0x4c0   :  { %v663_v62 = vmul.f32 %v1146_v51, %v1136_v61  ;;  %v667_v2 = vmul.f32 %v1146_v51, %v1138_v46 }
 0x4c2   :  { %673 = vperm.xlu1 %1024, %v663_v62  }
 0x4c3   :  { %v1148_v63 = vpop.eup %1147 }
 0x4c4   :  { %v664_v1 = vmul.f32 %v1148_v63, %v1140_v47  ;;  %v668_v48 = vmul.f32 %v1148_v63, %v1142_v54 }
 0x4c6   :  { %678 = vperm.xlu0 %1023, %v664_v1   ;;  %693 = vperm.xlu1 %1024, %v667_v2  }
 0x4ca   :  { %698 = vperm.xlu0 %1023, %v668_v48  }
 0x4d9   :  { %v996_v12 = vpop.f32.mrf.mxu1 }
 0x4db   :  { %v348_v8 = vpop.f32.mrf.mxu1 }
 0x4dd   :  { %v997_v53 = vpop.f32.mrf.mxu1 }
 0x525   :  { %v704_v3 = vpop.permute.xlu1 %703  ;;  %v684_v4 = vpop.permute.xlu0 %683 }
 0x526   :  { %v717_v0 = vmul.f32 %v704_v3, %v1312_v21  ;;  %v713_v5 = vmul.f32 %v684_v4, %v1309_v20 }
 0x528   :  { %v1444_v6 = vadd.f32 %v717_v0, %v713_v5 }
 0x52a   :  { %v725_v7 = vmul.f32 %v1444_v6, %v1444_v6 }
 0x52c   :  { %v733_v9 = vsel %vm98_vm0, %v725_v7, 0.0 }
 0x52d   :  { %734 = vadd.xlane.f32.xlu1 %v733_v9 }
 0x539   :  { %v689_v10 = vpop.permute.xlu1 %688  ;;  %v709_v11 = vpop.permute.xlu0 %708 }
 0x53a   :  { %v714_v14 = vmul.f32 %v689_v10, %v1317_v33  ;;  %v718_v15 = vmul.f32 %v709_v11, %v1320_v35 }
 0x53c   :  { %v1451_v16 = vadd.f32 %v718_v15, %v714_v14 }
 0x53d   :  { %v674_v17 = vpop.permute.xlu1 %673 }
 0x53e   :  { %v726_v20 = vmul.f32 %v1451_v16, %v1451_v16  ;;  %v711_v25 = vmul.f32 %v674_v17, %v1328_v42 }
 0x540   :  { %v736_v21 = vsel %vm98_vm0, %v726_v20, 0.0 }
 0x541   :  { %737 = vadd.xlane.f32.xlu0 %v736_v21  ;;  %v679_v19 = vpop.permute.xlu0 %678  ;;  %v694_v23 = vpop.permute.xlu1 %693 }
 0x542   :  { %v715_v27 = vmul.f32 %v694_v23, %v1323_v38  ;;  %v712_v35 = vmul.f32 %v679_v19, %v1334_v49  ;;  %v945_v49 = vld [vmem:[%s1542_s3] ss:$0 sm:$0xff] }
 0x543   :  { %v1473_v36 = vadd.f32 %v996_v12, %v945_v49  ;;  %v349_v18 = vadd.f32 %v945_v49, %v348_v8  ;;  %v1475_v37 = vadd.f32 %v997_v53, %v945_v49 }
 0x544   :  { %v1458_v28 = vadd.f32 %v715_v27, %v711_v25 }
 0x545   :  { %v699_v33 = vpop.permute.xlu0 %698  ;;  %v768_v40 = vpack.c.bf16 %v1475_v37, %v1473_v36 }
 0x546   :  { %v716_v29 = vmul.f32 %v699_v33, %v1337_v50  ;;  %v723_v30 = vmul.f32 %v1458_v28, %v1458_v28  ;;  %v351_v50 = vpop.f32.mrf.mxu1 }
 0x547   :  { %v352_v52 = vadd.f32 %v945_v49, %v351_v50 }
 0x548   :  { %v1464_v31 = vadd.f32 %v716_v29, %v712_v35  ;;  %v727_v34 = vsel %vm98_vm0, %v723_v30, 0.0  ;;  %v865_v30 = vstv %s1544_s7 }
 0x549   :  { %728 = vadd.xlane.f32.xlu0 %v727_v34  ;;  %v767_v41 = vpack.c.bf16 %v352_v52, %v349_v18 }
 0x54a   :  { %v724_v42 = vmul.f32 %v1464_v31, %v1464_v31 }
 0x54b   :  { %1006 = vmatprep.mubr.msk.bf16.mxu0 %vm98_vm0, %v767_v41 }
 0x54c   :  { %v730_v38 = vsel %vm98_vm0, %v724_v42, 0.0 }
 0x54d   :  { %731 = vadd.xlane.f32.xlu1 %v730_v38 }
 0x55b   :  { %v1000_v39 = vpop.f32.mrf.mxu1 }
 0x55c   :  { %v1479_v55 = vadd.f32 %v1000_v39, %v945_v49 }
 0x55d   :  { %v364_v13 = vpop.f32.mrf.mxu1 }
 0x55e   :  { %v365_v43 = vadd.f32 %v945_v49, %v364_v13 }
 0x55f   :  { %v1001_v56 = vpop.f32.mrf.mxu1 }
 0x560   :  { %v376_v26 = vadd.f32 %v1001_v56, %v945_v49 }
 0x561   :  { %v367_v44 = vpop.f32.mrf.mxu1 }
 0x562   :  { %v770_v57 = vpack.c.bf16 %v376_v26, %v1479_v55  ;;  %v368_v58 = vadd.f32 %v945_v49, %v367_v44 }
 0x564   :  { %v769_v45 = vpack.c.bf16 %v368_v58, %v365_v43 }
 0x566   :  { %1010 = vmatprep.mubr.msk.bf16.mxu1 %vm98_vm0, %v769_v45 }
 0x5b6   :  { %v735_v61 = vpop.xlane.xlu1 %734 }
 0x5b7   :  { %v741_v46 = vadd.f32 1.0, %v735_v61  ;;  %v753_v22 = vadd.f32 1e-09, %v735_v61 }
 0x5b9   :  { %1149 = vrcp.f32 %v741_v46 }
 0x5ba   :  { %1151 = vrsqrt.f32 %v753_v22 }
 0x5c6   :  { %v1150_v59 = vpop.eup %1149 }
 0x5c7   :  { %v748_v63 = vmul.f32 %v1150_v59, %v735_v61  ;;  %v1152_v48 = vpop.eup %1151 }
 0x5c9   :  { %v761_v4 = vmul.f32 %v1152_v48, %v748_v63 }
 0x5ca   :  { %v738_v47 = vpop.xlane.xlu0 %737 }
 0x5cb   :  { %v742_v54 = vadd.f32 1.0, %v738_v47  ;;  %v754_v24 = vadd.f32 1e-09, %v738_v47  ;;  %v765_v9 = vmul.f32 %v761_v4, %v1444_v6 }
 0x5cd   :  { %1153 = vrcp.f32 %v742_v54 }
 0x5ce   :  { %1155 = vrsqrt.f32 %v754_v24 }
 0x5d2   :  { %v729_v32 = vpop.xlane.xlu0 %728 }
 0x5d3   :  { %v739_v60 = vadd.f32 1.0, %v729_v32  ;;  %v751_v51 = vadd.f32 1e-09, %v729_v32 }
 0x5d5   :  { %1157 = vrcp.f32 %v739_v60 }
 0x5d6   :  { %v732_v62 = vpop.xlane.xlu1 %731  ;;  %1159 = vrsqrt.f32 %v751_v51 }
 0x5d7   :  { %v740_v1 = vadd.f32 1.0, %v732_v62  ;;  %v752_v2 = vadd.f32 1e-09, %v732_v62 }
 0x5d9   :  { %1161 = vrcp.f32 %v740_v1 }
 0x5da   :  { %v1154_v3 = vpop.eup %1153  ;;  %1163 = vrsqrt.f32 %v752_v2 }
 0x5db   :  { %v750_v0 = vmul.f32 %v1154_v3, %v738_v47  ;;  %v1156_v5 = vpop.eup %1155 }
 0x5dd   :  { %v762_v7 = vmul.f32 %v1156_v5, %v750_v0 }
 0x5df   :  { %v766_v10 = vmul.f32 %v762_v7, %v1451_v16 }
 0x5e1   :  { %v772_v11 = vpack.c.bf16 %v766_v10, %v765_v9 }
 0x5e2   :  { %v1158_v14 = vpop.eup %1157 }
 0x5e3   :  { %1018 = vmatprep.subr.msk.bf16.mxu0 %vm98_vm0, %v772_v11  ;;  %1019 = vmatprep.subr.msk.bf16.mxu1 %vm98_vm0, %v772_v11  ;;  %v789_v15 = vsel %vm98_vm0, %v772_v11, 0  ;;  %v744_v17 = vmul.f32 %v1158_v14, %v729_v32  ;;  %v1160_v20 = vpop.eup %1159 }
 0x5e4   :  { %1003 = vmatpush3.bf16.xpose.msra.mxu0 %v789_v15  ;;  %1016 = vmatpush3.bf16.xpose.msra.mxu1 %v789_v15 }
 0x5e5   :  { %v759_v19 = vmul.f32 %v1160_v20, %v744_v17 }
 0x5e6   :  { %v1162_v21 = vpop.eup %1161 }
 0x5e7   :  { %v746_v23 = vmul.f32 %v1162_v21, %v732_v62  ;;  %v1164_v25 = vpop.eup %1163  ;;  %v763_v6 = vmul.f32 %v759_v19, %v1458_v28  ;;  %v856_v28 = vstv %s1543_s6 }
 0x5e9   :  { %v760_v27 = vmul.f32 %v1164_v25, %v746_v23 }
 0x5eb   :  { %v764_v16 = vmul.f32 %v760_v27, %v1464_v31 }
 0x5ed   :  { %v771_v33 = vpack.c.bf16 %v764_v16, %v763_v6 }
 0x5ef   :  { %1020 = vmatprep.subr.msk.bf16.mxu0 %vm98_vm0, %v771_v33  ;;  %1021 = vmatprep.subr.msk.bf16.mxu1 %vm98_vm0, %v771_v33  ;;  %v786_v35 = vsel %vm98_vm0, %v771_v33, 0 }
 0x5f0   :  { %1005 = vmatpush3.bf16.xpose.msra.mxu0 %v786_v35  ;;  %1017 = vmatpush3.bf16.xpose.msra.mxu1 %v786_v35 }
 0x5f7   :  { %1007 = vmatmul.mubr.msk.bf16.vlgmr.msra.gmra.mxu0 %vm98_vm0, %v768_v40  ;;  %1011 = vmatmul.mubr.msk.bf16.vlgmr.msra.gmra.mxu1 %vm98_vm0, %v770_v57 }
 0x6b7   :  { %v1008_v29 = vpop.f32.mrf.mxu0  ;;  %v1012_v31 = vpop.f32.mrf.mxu1 }
 0x6b8   :  { %v859_v34 = vmul.f32 %v1008_v29, %v856_v28  ;;  %v863_v42 = vmul.f32 %v1012_v31, %v856_v28 }
 0x6b9   :  { %v825_v38 = vpop.f32.mrf.mxu0  ;;  %v841_v12 = vpop.f32.mrf.mxu1 }
 0x6ba   :  { %v868_v8 = vadd.f32 %v865_v30, %v859_v34  ;;  %v872_v53 = vadd.f32 %v865_v30, %v863_v42  ;;  %v857_v49 = vmul.f32 %v856_v28, %v825_v38  ;;  %v861_v50 = vmul.f32 %v856_v28, %v841_v12 }
 0x6bb   :  { %v1009_v36 = vpop.f32.mrf.mxu0  ;;  %v1013_v18 = vpop.f32.mrf.mxu1 }
 0x6bc   :  { %v876_v37 = vsub.f32 0.0, %v868_v8  ;;  %v880_v52 = vsub.f32 0.0, %v872_v53  ;;  %v866_v39 = vadd.f32 %v865_v30, %v857_v49  ;;  %v870_v40 = vadd.f32 %v865_v30, %v861_v50 }
 0x6bd   :  { %v860_v41 = vmul.f32 %v1009_v36, %v856_v28  ;;  %v864_v13 = vmul.f32 %v1013_v18, %v856_v28  ;;  %v828_v55 = vpop.f32.mrf.mxu0  ;;  %v844_v56 = vpop.f32.mrf.mxu1 }
 0x6be   :  { %v886_v43 = vmul.f32 1.442695, %v876_v37  ;;  %v894_v26 = vmul.f32 1.442695, %v880_v52  ;;  %v874_v44 = vsub.f32 0.0, %v866_v39  ;;  %v878_v57 = vsub.f32 0.0, %v870_v40 }
 0x6bf   :  { %v869_v58 = vadd.f32 %v865_v30, %v860_v41  ;;  %v873_v45 = vadd.f32 %v865_v30, %v864_v13  ;;  %v858_v61 = vmul.f32 %v856_v28, %v828_v55  ;;  %v862_v46 = vmul.f32 %v856_v28, %v844_v56 }
 0x6c0   :  { %1165 = vpow2.f32 %v886_v43  ;;  %v882_v22 = vmul.f32 1.442695, %v874_v44  ;;  %v890_v47 = vmul.f32 1.442695, %v878_v57 }
 0x6c1   :  { %1167 = vpow2.f32 %v894_v26  ;;  %v877_v54 = vsub.f32 0.0, %v869_v58  ;;  %v881_v24 = vsub.f32 0.0, %v873_v45  ;;  %v867_v32 = vadd.f32 %v865_v30, %v858_v61 }
 0x6c2   :  { %1169 = vpow2.f32 %v882_v22  ;;  %v871_v59 = vadd.f32 %v865_v30, %v862_v46 }
 0x6c3   :  { %1171 = vpow2.f32 %v890_v47  ;;  %v888_v60 = vmul.f32 1.442695, %v877_v54  ;;  %v896_v51 = vmul.f32 1.442695, %v881_v24  ;;  %v875_v62 = vsub.f32 0.0, %v867_v32 }
 0x6c4   :  { %v879_v63 = vsub.f32 0.0, %v871_v59 }
 0x6c5   :  { %1173 = vpow2.f32 %v888_v60  ;;  %v884_v1 = vmul.f32 1.442695, %v875_v62 }
 0x6c6   :  { %1175 = vpow2.f32 %v896_v51  ;;  %v892_v2 = vmul.f32 1.442695, %v879_v63 }
 0x6c7   :  { %1177 = vpow2.f32 %v884_v1 }
 0x6c8   :  { %1179 = vpow2.f32 %v892_v2 }
 0x6cd   :  { %v1166_v48 = vpop.eup %1165 }
 0x6ce   :  { %v1168_v3 = vpop.eup %1167  ;;  %v900_v4 = vadd.f32 1.0, %v1166_v48 }
 0x6cf   :  { %v1170_v0 = vpop.eup %1169  ;;  %v904_v5 = vadd.f32 1.0, %v1168_v3 }
 0x6d0   :  { %v1172_v7 = vpop.eup %1171  ;;  %1181 = vrcp.f32 %v900_v4  ;;  %v898_v9 = vadd.f32 1.0, %v1170_v0 }
 0x6d1   :  { %1183 = vrcp.f32 %v904_v5  ;;  %v902_v10 = vadd.f32 1.0, %v1172_v7 }
 0x6d2   :  { %v1174_v11 = vpop.eup %1173  ;;  %1185 = vrcp.f32 %v898_v9 }
 0x6d3   :  { %v1176_v14 = vpop.eup %1175  ;;  %1187 = vrcp.f32 %v902_v10  ;;  %v901_v15 = vadd.f32 1.0, %v1174_v11 }
 0x6d4   :  { %v1178_v17 = vpop.eup %1177  ;;  %v905_v20 = vadd.f32 1.0, %v1176_v14 }
 0x6d5   :  { %v1180_v21 = vpop.eup %1179  ;;  %1189 = vrcp.f32 %v901_v15  ;;  %v899_v19 = vadd.f32 1.0, %v1178_v17 }
 0x6d6   :  { %1191 = vrcp.f32 %v905_v20  ;;  %v903_v23 = vadd.f32 1.0, %v1180_v21 }
 0x6d7   :  { %1193 = vrcp.f32 %v899_v19 }
 0x6d8   :  { %1195 = vrcp.f32 %v903_v23 }
 0x6dd   :  { %v1182_v25 = vpop.eup %1181 }
 0x6de   :  { %v1184_v27 = vpop.eup %1183  ;;  %924 = vst.msk [vmem:[%s1545_s8 + $0x10] sm:$0xff] %vm98_vm0, %v1182_v25 }
 0x6df   :  { %v1186_v6 = vpop.eup %1185  ;;  %928 = vst.msk [vmem:[%s1545_s8 + $0x30] sm:$0xff] %vm98_vm0, %v1184_v27 }
 0x6e0   :  { %v1188_v16 = vpop.eup %1187  ;;  %922 = vst.msk [vmem:[%s1545_s8] sm:$0xff] %vm98_vm0, %v1186_v6 }
 0x6e1   :  { %926 = vst.msk [vmem:[%s1545_s8 + $0x20] sm:$0xff] %vm98_vm0, %v1188_v16 }
 0x6e2   :  { %v1190_v33 = vpop.eup %1189 }
 0x6e3   :  { %v1192_v35 = vpop.eup %1191  ;;  %925 = vst.msk [vmem:[%s1545_s8 + $0x18] sm:$0xff] %vm98_vm0, %v1190_v33 }
 0x6e4   :  { %v1194_v28 = vpop.eup %1193  ;;  %929 = vst.msk [vmem:[%s1545_s8 + $0x38] sm:$0xff] %vm98_vm0, %v1192_v35 }
 0x6e5   :  { %v1196_v29 = vpop.eup %1195  ;;  %923 = vst.msk [vmem:[%s1545_s8 + $0x8] sm:$0xff] %vm98_vm0, %v1194_v28 }
 0x6e6   :  { %927 = vst.msk [vmem:[%s1545_s8 + $0x28] sm:$0xff] %vm98_vm0, %v1196_v29 }

</bundles_post_ra>
